<compile_context>
chip_gen: v6e
topology: v6e:2x2x1
jax: 0.10.0
libtpu: 0.0.40
codegen_flags: <defaults>
</compile_context>

<pallas_src>
import jax
import jax.numpy as jnp
from jax.experimental import pallas as pl
from jax.experimental.pallas import tpu as pltpu


def _add_pos_kernel(x_ref, pos_ref, o_ref):
    # x_ref:   (TB, TN) tile of the flattened activation
    # pos_ref: (1,  TN) matching tile of the flattened positional embedding,
    #          broadcast over the batch/sublane axis by the VPU.
    o_ref[...] = x_ref[...] + pos_ref[...]


def _choose_col_tile(n_cols, row_tile, itemsize, max_block_bytes):
    """Lane-dense column tile (multiple of 128) bounded by a per-block byte budget."""
    max_cols = max(128, max_block_bytes // (row_tile * itemsize))
    if n_cols <= max_cols:
        return n_cols                       # full extent: always a legal block shape
    return max(128, (max_cols // 128) * 128)  # multiple of 128 -> unmasked vst


def abs_pos_embed_forward(x, pos_embed, sampled_embed_dim=None,
                          *, max_block_bytes=2 * 1024 * 1024):
    """x: (B, L, D_s), pos_embed: (1, L, D). Returns x + pos_embed[..., :D_s]."""
    B, L, D_s = x.shape
    if sampled_embed_dim is None:
        sampled_embed_dim = D_s
    assert D_s == sampled_embed_dim, "x's embed dim must equal sampled_embed_dim"
    assert pos_embed.shape[0] == 1 and pos_embed.shape[1] == L
    assert pos_embed.shape[2] >= sampled_embed_dim

    # sample_parameters(): slice the embed dim.  pos is tiny compared with x, so a
    # wrapper-side slice (one small copy only when D_s < D) is cheaper than keeping
    # a third, non-lane-dense D axis in the kernel just to slice via BlockSpec.
    if pos_embed.shape[2] != sampled_embed_dim:
        pos = pos_embed[..., :sampled_embed_dim]
    else:
        pos = pos_embed
    pos = pos.astype(x.dtype)

    # Lane-dense layout: merge (L, D_s) -> N (row-major reshape, no data movement).
    N = L * D_s
    x2 = x.reshape(B, N)
    pos2 = pos.reshape(1, N)

    itemsize = x.dtype.itemsize
    # Minimum sublane granularity per dtype (f32: 8, bf16: 16, int8/fp8: 32).
    min_sublane = {4: 8, 2: 16, 1: 32}.get(itemsize, 8)
    tb = B if B <= min_sublane else min_sublane
    tn = _choose_col_tile(N, tb, itemsize, max_block_bytes)

    grid = (pl.cdiv(B, tb), pl.cdiv(N, tn))

    out2 = pl.pallas_call(
        _add_pos_kernel,
        out_shape=jax.ShapeDtypeStruct((B, N), x.dtype),
        grid=grid,
        in_specs=[
            pl.BlockSpec((tb, tn), lambda bi, ci: (bi, ci)),
            # pos: same column tile for every batch tile (broadcast over B).
            # pipeline_mode=pl.Buffered(1) would halve this operand's footprint, but
            # its block index changes along `ci`, so single-buffering would expose
            # its DMA; at (1, tn) it is only ~tn*itemsize bytes, so keep the default.
            pl.BlockSpec((1, tn), lambda bi, ci: (0, ci)),
        ],
        out_specs=pl.BlockSpec((tb, tn), lambda bi, ci: (bi, ci)),
        compiler_params=pltpu.CompilerParams(
            # Both axes independent -> megacore / v7x 2-TC sharding even for B=1.
            dimension_semantics=("parallel", "parallel"),
        ),
        # input_output_aliases={0: 0} would make the add in place on x (footprint
        # win only, same bytes moved); omitted so callers can keep using x.
    )(x2, pos2)

    return out2.reshape(B, L, D_s)


def trunc_normal_init(key, shape, std=0.02, dtype=jnp.float32):
    # truncated normal in [-2std, 2std], matching trunc_normal_(std=0.02)
    return std * jax.random.truncated_normal(key, -2.0, 2.0, shape, dtype)


if __name__ == "__main__":
    key = jax.random.PRNGKey(0)
    k_x1, k_p1, k_x2, k_p2, k_x3, k_p3 = jax.random.split(key, 6)

    # --- Test 1: basic shape (B=2, L=8, D=32), single tile -------------------
    B, L, D = 2, 8, 32
    pos_embed = trunc_normal_init(k_p1, (1, L, D), std=0.02)
    x = jax.random.normal(k_x1, (B, L, D), dtype=jnp.float32)
    out = jax.block_until_ready(abs_pos_embed_forward(x, pos_embed, D))
    ref = x + pos_embed
    assert out.shape == (B, L, D)
    assert jnp.allclose(out, ref, atol=1e-6), "test 1 mismatch vs reference"

    # --- Test 2: longer sequence, small block budget -> multi-tile grid ------
    B, L, D = 2, 64, 32                      # N = 2048 -> 4 column tiles of 512
    pos_embed = trunc_normal_init(k_p2, (1, L, D), std=0.02)
    x = jax.random.normal(k_x2, (B, L, D), dtype=jnp.float32)
    out = jax.block_until_ready(
        abs_pos_embed_forward(x, pos_embed, D, max_block_bytes=4096))
    ref = x + pos_embed
    assert jnp.allclose(out, ref, atol=1e-6), "test 2 mismatch vs reference"

    # --- Test 3: sampled_embed_dim < embed_dim (supernet slice path) ---------
    B, L, D_full, D_s = 2, 8, 48, 32
    pos_embed = trunc_normal_init(k_p3, (1, L, D_full), std=0.02)
    x = jax.random.normal(k_x3, (B, L, D_s), dtype=jnp.float32)
    out = jax.block_until_ready(abs_pos_embed_forward(x, pos_embed, D_s))
    ref = x + pos_embed[..., :D_s]
    assert jnp.allclose(out, ref, atol=1e-6), "test 3 mismatch vs reference"

    print("KERNEL_OK")
</pallas_src>

<mosaic_0001>
module attributes {stable_mosaic.version = 11 : i64} {
  func.func @_add_pos_kernel(%arg0: i32, %arg1: i32, %arg2: memref<2x256xf32, #tpu.memory_space<vmem>>, %arg3: memref<1x256xf32, #tpu.memory_space<vmem>>, %arg4: memref<2x256xf32, #tpu.memory_space<vmem>>) attributes {dimension_semantics = [#tpu.dimension_semantics<parallel>, #tpu.dimension_semantics<parallel>], iteration_bounds = array<i64: 1, 1>, scalar_prefetch = 0 : i64, scratch_operands = 0 : i64, tpu.core_type = #tpu.core_type<tc>, window_params = [{transform_indices = @transform_0, window_bounds = array<i64: 2, 256>}, {transform_indices = @transform_1, window_bounds = array<i64: 1, 256>}, {transform_indices = @transform_2, window_bounds = array<i64: 2, 256>}]} {
    %c0 = arith.constant 0 : index
    %c0_0 = arith.constant 0 : index
    %0 = vector.load %arg2[%c0, %c0_0] : memref<2x256xf32, #tpu.memory_space<vmem>>, vector<2x256xf32>
    %c0_1 = arith.constant 0 : index
    %c0_2 = arith.constant 0 : index
    %1 = vector.load %arg3[%c0_1, %c0_2] : memref<1x256xf32, #tpu.memory_space<vmem>>, vector<1x256xf32>
    %2 = vector.broadcast %1 : vector<1x256xf32> to vector<2x256xf32>
    %3 = arith.addf %0, %2 : vector<2x256xf32>
    %c0_3 = arith.constant 0 : index
    %c0_4 = arith.constant 0 : index
    %4 = vector.load %arg4[%c0_3, %c0_4] : memref<2x256xf32, #tpu.memory_space<vmem>>, vector<2x256xf32>
    tpu.vector_store %arg4[%c0_3, %c0_4], %3 {strides = array<i32>} : memref<2x256xf32, #tpu.memory_space<vmem>>, vector<2x256xf32>,
    return
  }
  func.func @transform_0(%arg0: i32, %arg1: i32) -> (i32, i32) {
    %c0_i32 = arith.constant 0 : i32
    return %arg0, %arg1 : i32, i32
  }
  func.func @transform_1(%arg0: i32, %arg1: i32) -> (i32, i32) {
    %c0_i32 = arith.constant 0 : i32
    %c0_i32_0 = arith.constant 0 : i32
    return %c0_i32, %arg1 : i32, i32
  }
  func.func @transform_2(%arg0: i32, %arg1: i32) -> (i32, i32) {
    %c0_i32 = arith.constant 0 : i32
    return %arg0, %arg1 : i32, i32
  }
}

</mosaic_0001>

<bundles_post_ra>
// kernel: tpu_custom_call.1
= control target key start
LH: loop header
LB: loop body
LE: loop exit
PB: predicated region body
PF: predicated region fallthrough
CT: control target
= control target key end

     0   :  { %7 = vsyncpa [#allocation3], 0  ;;  %s172_s0 = inlined_call_operand.hbm [shape: f32[2,256], index: 0, kind: input, shape index: {}]   ;;  %s173_s1 = inlined_call_operand.hbm [shape: f32[1,256], index: 1, kind: input, shape index: {}]   ;;  %s174_s2 = inlined_call_operand.hbm [shape: f32[2,256], index: 2, kind: output, shape index: {}]  }
   0x1   :  { %8 = vsyncpa [#allocation6], 0 }
   0x2   :  { %9 = vsyncpa [#allocation4], 0  ;;  %s144_s9 = smov [#allocation2]   ;;  %s145_s11 = smov [#allocation5]  }
   0x3   :  { %s16_s10 = sshll.u32 %s144_s9, 4  ;;  %s26_s12 = sshll.u32 %s145_s11, 4  ;;  %s17_s10 = int_to_ptr.vmem [resolvable:$true] %s16_s10  ;;  %s27_s12 = int_to_ptr.vmem [resolvable:$true] %s26_s12 }
   0x4   :  { %s86_s13 = scalar_lea.vmem %s17_s10, 64  ;;  %p91_p1 = scmp.lt.s32.totalorder %s17_s10, %s17_s10 }
   0x5   :  { %p87_p0 = scmp.ne.s32.totalorder %s17_s10, %s86_s13  ;;  %p92_p2 = scmp.lt.s32.totalorder %s86_s13, %s86_s13 }
   0x7   :  { %p93_p3 = por %p92_p2, %p91_p1 }
   0x9   :  { %p94_p4 = pnand %p93_p3, %p87_p0 }
   0xb   :  { %97 = shalt.err (!%p94_p4)
}
   0xc   :  { %19 = dma.hbm_to_vmem [thread:$0]  %s172_s0, 64, %s17_s10, [#allocation3]  }
   0xd   :  { %s106_s16 = scalar_lea.vmem %s27_s12, 32  ;;  %p111_p6 = scmp.lt.s32.totalorder %s27_s12, %s27_s12 }
   0xe   :  { %p107_p5 = scmp.ne.s32.totalorder %s27_s12, %s106_s16  ;;  %p112_p7 = scmp.lt.s32.totalorder %s106_s16, %s106_s16 }
  0x10   :  { %p113_p8 = por %p112_p7, %p111_p6 }
  0x12   :  { %p114_p9 = pnand %p113_p8, %p107_p5 }
  0x14   :  { %117 = shalt.err (!%p114_p9)
}
  0x15   :  { %29 = dma.hbm_to_vmem [thread:$0]  %s173_s1, 32, %s27_s12, [#allocation6]  }
  0x16   :  { %138 = dma.done.wait [#allocation3], 64  }
  0x17   :  { %139 = vsyncadd [#allocation3], 4294967232 }
  0x18   :  { %140 = dma.done.wait [#allocation6], 32  }
  0x19   :  { %141 = vsyncadd [#allocation6], 4294967264  ;;  %v39_v0 = vlaneseq  ;;  %v146_v1 = vmov 1983009808   ;;  %v37_v7 = vld [vmem:[#allocation5] sm:$0x3] }
  0x1a   :  { %v49_v2 = vunpack.c.l.s4 %v146_v1  ;;  %v36_v12 = vld [vmem:[#allocation2] sm:$0xf]  ;;  %s147_s0 = smov [#allocation7]  }
  0x1b   :  { %v40_v3 = vshrl.u32 %v39_v0, 7  ;;  %s64_s19 = sshll.u32 %s147_s0, 4  ;;  %s65_s19 = int_to_ptr.vmem [resolvable:$true] %s64_s19 }
  0x1c   :  { %v50_v6 = vunpack.c.0.s8 %v49_v2  ;;  %s118_s1 = scalar_lea.vmem %s65_s19, 64  ;;  %p123_p11 = scmp.lt.s32.totalorder %s65_s19, %s65_s19 }
  0x1d   :  { %v41_v4 = vsub.s32 0, %v40_v3  ;;  %v45_v5 = vsub.s32 1, %v40_v3  ;;  %p119_p10 = scmp.ne.s32.totalorder %s65_s19, %s118_s1  ;;  %p124_p12 = scmp.lt.s32.totalorder %s118_s1, %s118_s1 }
  0x1e   :  { %v53_v10 = vsub.s32 %v50_v6, %v40_v3 }
  0x1f   :  { %v42_v8 = vrot.slane %v37_v7, %v41_v4  ;;  %v46_v9 = vrot.slane %v37_v7, %v45_v5  ;;  %p125_p13 = por %p124_p12, %p123_p11 }
  0x21   :  { %v47_v11 = vcombine.low %v42_v8, %v46_v9  ;;  %p126_p0 = pnand %p125_p13, %p119_p10 }
  0x23   :  { %v54_v13 = vrot.slane %v47_v11, %v53_v10 }
  0x25   :  { %v56_v14 = vadd.f32 %v54_v13, %v36_v12 }
  0x27   :  { %57 = vst [vmem:[#allocation7] sm:$0xf] %v56_v14 }
  0x28   :  { %129 = shalt.err (!%p126_p0)
}
  0x29   :  { %67 = dma.vmem_to_hbm [thread:$0]  %s65_s19, 64, %s174_s2, [#allocation4]  }
  0x2a   :  { %142 = dma.done.wait [#allocation4], 64  }
  0x2b   :  { %143 = vsyncadd [#allocation4], 4294967232 }
  0x2c   :  { %71 = vsyncpa [#allocation3], 1 }
  0x2d   :  { %72 = vsyncpa [#allocation6], 1 }
  0x2e   :  { %73 = vsyncpa [#allocation4], 1 }

</bundles_post_ra>
